<compile_context>
chip_gen: v7x
topology: tpu7x:2x2x1
jax: 0.10.0
libtpu: 0.0.40
codegen_flags: <defaults>
</compile_context>

<pallas_src>
import functools

import jax
import jax.numpy as jnp
from jax.experimental import pallas as pl
from jax.experimental.pallas import tpu as pltpu


def _ca_block_kernel(x_ref, w1_ref, wh_ref, ww_ref, ep_ref, scale_ref,
                     eh_ref, ew_ref, o_ref, *, NB, H, W):
    """Processes NB batch elements; all big arrays are lane-dense (last dim H*W)."""
    # Tiny constant operands (fetched once; single-buffered).
    ep = ep_ref[...]                               # (HW, H+W) one-hot, x dtype
    scale = scale_ref[...]                         # (1, H+W) f32: [1/W]*H ++ [1/H]*W
    w1 = w1_ref[...].astype(jnp.float32)           # (mid, C)
    wh = wh_ref[...].astype(jnp.float32)           # (C, mid)
    ww = ww_ref[...].astype(jnp.float32)           # (C, mid)
    eh = eh_ref[...]                               # (H, HW) one-hot, x dtype
    ew = ew_ref[...]                               # (W, HW) one-hot, x dtype
    out_dtype = o_ref.dtype

    # NB is small and static: unroll so the independent per-sample chains
    # interleave and the per-grid-step overhead is amortized.
    for b in range(NB):
        # ---- Pooling: sums over W (per h) and over H (per w) in one MXU matmul
        # against the concatenated one-hot selector; f32 scale row -> means.
        raw = jnp.dot(x_ref[b], ep, preferred_element_type=jnp.float32)  # (C, H+W)
        pool = raw * scale                         # == cat([x_h, x_w], dim=-1)

        # ---- 1x1 convs (bias=False) in f32 ----------------------------------
        y = jnp.maximum(
            jnp.dot(w1, pool, preferred_element_type=jnp.float32), 0.0)   # (mid, H+W)
        s_h = jax.nn.sigmoid(
            jnp.dot(wh, y[:, :H], preferred_element_type=jnp.float32))    # (C, H)
        s_w = jax.nn.sigmoid(
            jnp.dot(ww, y[:, H:], preferred_element_type=jnp.float32))    # (C, W)

        # ---- Broadcast gates back to (C, HW) via one-hot expander matmuls ----
        # (stays lane-dense, rides the MXU; f32 accumulation is exact here
        # because each selector column is one-hot — no accumulation occurs).
        gate_h = jnp.dot(s_h.astype(out_dtype), eh,
                         preferred_element_type=jnp.float32)               # (C, HW)
        gate_w = jnp.dot(s_w.astype(out_dtype), ew,
                         preferred_element_type=jnp.float32)               # (C, HW)
        gate = (gate_h * gate_w).astype(out_dtype)

        # Re-read x at the point of use (short live range); lane-dense store.
        o_ref[b] = x_ref[b] * gate


def _pad2(rows, cols, itemsize):
    """Bytes of a 2-D tile after (8, 128) layout padding."""
    return ((rows + 7) // 8 * 8) * ((cols + 127) // 128 * 128) * itemsize


def ca_block(x, w1, wh, ww):
    N, C, H, W = x.shape
    HW = H * W
    mid = w1.shape[0]
    dtype = x.dtype
    itemsize = dtype.itemsize

    # Lane-dense view; free (trailing NCHW dims are contiguous in memory).
    x2 = x.reshape(N, C, HW)

    # ---- Batch blocking: amortize per-grid-step overhead for small tiles ----
    per_sample_bytes = C * HW * itemsize
    nb_cap = max(1, min(8, (2 * 1024 * 1024) // max(per_sample_bytes, 1)))
    NB = 1
    for d in range(1, N + 1):
        if N % d == 0 and d <= nb_cap:
            NB = d
    grid = (N // NB,)

    # ---- Tiny constant one-hot selection matrices + f32 mean-scale row -------
    k = jnp.arange(HW)
    sel_h = (k[:, None] // W) == jnp.arange(H)[None, :]        # (HW, H): k//W == h
    sel_w = (k[:, None] % W) == jnp.arange(W)[None, :]         # (HW, W): k%W  == w
    e_pool = jnp.concatenate([sel_h, sel_w], axis=1).astype(dtype)   # (HW, H+W)
    e_h = sel_h.T.astype(dtype)                                # (H, HW)
    e_w = sel_w.T.astype(dtype)                                # (W, HW)
    scale = jnp.concatenate(
        [jnp.full((1, H), 1.0 / W, dtype=jnp.float32),
         jnp.full((1, W), 1.0 / H, dtype=jnp.float32)], axis=1)  # (1, H+W) f32

    kernel = functools.partial(_ca_block_kernel, NB=NB, H=H, W=W)

    # ---- Advisory cost estimate for XLA scheduling around the custom call ----
    flops = 2 * N * (C * HW * (H + W)          # pooling matmul
                     + mid * C * (H + W)       # conv_1x1
                     + 2 * C * mid * (H + W)   # F_h + F_w
                     + C * (H + W) * HW)       # gate-broadcast matmuls
    cost = pl.CostEstimate(
        flops=int(flops + 3 * N * C * HW),
        transcendentals=int(N * C * (H + W)),
        bytes_accessed=int(2 * N * C * HW * itemsize),
    )

    # ---- Explicit VMEM budget (capped at 48 MiB so it is valid on v7x) -------
    tile_pad = NB * _pad2(C, HW, itemsize)               # one (NB, C, HW) buffer
    io_bytes = 2 * 2 * tile_pad                          # x + out, double-buffered
    gate_bytes = 2 * NB * _pad2(C, HW, 4)                # gate_h/gate_w f32 temps
    sel_bytes = (_pad2(HW, H + W, itemsize) + _pad2(H, HW, itemsize)
                 + _pad2(W, HW, itemsize) + _pad2(1, H + W, 4))
    wt_bytes = _pad2(mid, C, w1.dtype.itemsize) + 2 * _pad2(C, mid, wh.dtype.itemsize)
    need = io_bytes + gate_bytes + sel_bytes + wt_bytes
    vmem_limit = int(min(48 * 1024 * 1024,
                         max(32 * 1024 * 1024, int(1.25 * need))))

    # Constant operands: fetched once, single-buffered.
    const1 = pl.Buffered(1)

    out2 = pl.pallas_call(
        kernel,
        out_shape=jax.ShapeDtypeStruct((N, C, HW), dtype),
        grid_spec=pltpu.PrefetchScalarGridSpec(
            num_scalar_prefetch=0,
            grid=grid,
            in_specs=[
                pl.BlockSpec((NB, C, HW), lambda n: (n, 0, 0)),               # x
                pl.BlockSpec((mid, C), lambda n: (0, 0), pipeline_mode=const1),    # conv_1x1 w
                pl.BlockSpec((C, mid), lambda n: (0, 0), pipeline_mode=const1),    # F_h w
                pl.BlockSpec((C, mid), lambda n: (0, 0), pipeline_mode=const1),    # F_w w
                pl.BlockSpec((HW, H + W), lambda n: (0, 0), pipeline_mode=const1),  # pool selector
                pl.BlockSpec((1, H + W), lambda n: (0, 0), pipeline_mode=const1),   # f32 mean scale
                pl.BlockSpec((H, HW), lambda n: (0, 0), pipeline_mode=const1),      # h-gate expander
                pl.BlockSpec((W, HW), lambda n: (0, 0), pipeline_mode=const1),      # w-gate expander
            ],
            out_specs=pl.BlockSpec((NB, C, HW), lambda n: (n, 0, 0)),
        ),
        compiler_params=pltpu.CompilerParams(
            dimension_semantics=("parallel",),
            vmem_limit_bytes=vmem_limit,
        ),
        cost_estimate=cost,
        # NOTE: callers that no longer need x can wrap this with
        # input_output_aliases={0: 0} to donate x's HBM buffer.
    )(x2, w1, wh, ww, e_pool, scale, e_h, e_w)

    return out2.reshape(N, C, H, W)


def ca_block_ref(x, w1, wh, ww):
    """Pure-JAX reference mirroring the PyTorch forward."""
    N, C, H, W = x.shape
    pool_h = jnp.mean(x, axis=3)                                  # (N, C, H)
    pool_w = jnp.mean(x, axis=2)                                  # (N, C, W)
    cat = jnp.concatenate([pool_h, pool_w], axis=-1)              # (N, C, H+W)
    y = jax.nn.relu(jnp.einsum('mc,ncl->nml', w1, cat))           # (N, mid, H+W)
    y_h, y_w = y[..., :H], y[..., H:]
    s_h = jax.nn.sigmoid(jnp.einsum('cm,nmh->nch', wh, y_h))      # (N, C, H)
    s_w = jax.nn.sigmoid(jnp.einsum('cm,nmw->ncw', ww, y_w))      # (N, C, W)
    return x * s_h[:, :, :, None] * s_w[:, :, None, :]


if __name__ == "__main__":
    # Small shapes consistent with the module: reduction=16 => C must be >= 16.
    N, C, H, W = 2, 32, 16, 16
    reduction = 16
    mid = C // reduction

    key = jax.random.PRNGKey(0)
    kx, k1, kh, kw = jax.random.split(key, 4)

    x = jax.random.normal(kx, (N, C, H, W), dtype=jnp.float32)
    # 1x1 conv weights stored as matrices (out_channels, in_channels),
    # equivalent to PyTorch (out, in, 1, 1) with the trailing dims squeezed.
    w_conv1x1 = jax.random.normal(k1, (mid, C), dtype=jnp.float32) * 0.1
    w_fh = jax.random.normal(kh, (C, mid), dtype=jnp.float32) * 0.1
    w_fw = jax.random.normal(kw, (C, mid), dtype=jnp.float32) * 0.1

    out = jax.block_until_ready(ca_block(x, w_conv1x1, w_fh, w_fw))
    ref = ca_block_ref(x, w_conv1x1, w_fh, w_fw)

    assert out.shape == (N, C, H, W)
    # Tolerance allows for MXU matmul rounding differences between the kernel's
    # matmul-based pooling/broadcast and the reference's exact mean/broadcast.
    assert jnp.allclose(out, ref, atol=1e-3, rtol=1e-2), "mismatch vs reference"

    print("KERNEL_OK")
</pallas_src>

<mosaic_0001>
module attributes {stable_mosaic.version = 11 : i64} {
  func.func @_ca_block_kernel(%arg0: i32, %arg1: memref<2x32x256xf32, #tpu.memory_space<vmem>>, %arg2: memref<2x32xf32, #tpu.memory_space<vmem>>, %arg3: memref<32x2xf32, #tpu.memory_space<vmem>>, %arg4: memref<32x2xf32, #tpu.memory_space<vmem>>, %arg5: memref<256x32xf32, #tpu.memory_space<vmem>>, %arg6: memref<1x32xf32, #tpu.memory_space<vmem>>, %arg7: memref<16x256xf32, #tpu.memory_space<vmem>>, %arg8: memref<16x256xf32, #tpu.memory_space<vmem>>, %arg9: memref<2x32x256xf32, #tpu.memory_space<vmem>>) attributes {dimension_semantics = [#tpu.dimension_semantics<parallel>], iteration_bounds = array<i64: 1>, scalar_prefetch = 0 : i64, scratch_operands = 0 : i64, tpu.core_type = #tpu.core_type<tc>, window_params = [{transform_indices = @transform_0, window_bounds = array<i64: 2, 32, 256>}, {pipeline_mode = #tpu.pipeline_mode<synchronous>, transform_indices = @transform_1, window_bounds = array<i64: 2, 32>}, {pipeline_mode = #tpu.pipeline_mode<synchronous>, transform_indices = @transform_2, window_bounds = array<i64: 32, 2>}, {pipeline_mode = #tpu.pipeline_mode<synchronous>, transform_indices = @transform_3, window_bounds = array<i64: 32, 2>}, {pipeline_mode = #tpu.pipeline_mode<synchronous>, transform_indices = @transform_4, window_bounds = array<i64: 256, 32>}, {pipeline_mode = #tpu.pipeline_mode<synchronous>, transform_indices = @transform_5, window_bounds = array<i64: 1, 32>}, {pipeline_mode = #tpu.pipeline_mode<synchronous>, transform_indices = @transform_6, window_bounds = array<i64: 16, 256>}, {pipeline_mode = #tpu.pipeline_mode<synchronous>, transform_indices = @transform_7, window_bounds = array<i64: 16, 256>}, {transform_indices = @transform_8, window_bounds = array<i64: 2, 32, 256>}]} {
    %c0 = arith.constant 0 : index
    %c0_0 = arith.constant 0 : index
    %0 = vector.load %arg5[%c0, %c0_0] : memref<256x32xf32, #tpu.memory_space<vmem>>, vector<256x32xf32>
    %c0_1 = arith.constant 0 : index
    %c0_2 = arith.constant 0 : index
    %1 = vector.load %arg6[%c0_1, %c0_2] : memref<1x32xf32, #tpu.memory_space<vmem>>, vector<1x32xf32>
    %c0_3 = arith.constant 0 : index
    %c0_4 = arith.constant 0 : index
    %2 = vector.load %arg2[%c0_3, %c0_4] : memref<2x32xf32, #tpu.memory_space<vmem>>, vector<2x32xf32>
    %c0_5 = arith.constant 0 : index
    %c0_6 = arith.constant 0 : index
    %3 = vector.load %arg3[%c0_5, %c0_6] : memref<32x2xf32, #tpu.memory_space<vmem>>, vector<32x2xf32>
    %c0_7 = arith.constant 0 : index
    %c0_8 = arith.constant 0 : index
    %4 = vector.load %arg4[%c0_7, %c0_8] : memref<32x2xf32, #tpu.memory_space<vmem>>, vector<32x2xf32>
    %c0_9 = arith.constant 0 : index
    %c0_10 = arith.constant 0 : index
    %5 = vector.load %arg7[%c0_9, %c0_10] : memref<16x256xf32, #tpu.memory_space<vmem>>, vector<16x256xf32>
    %c0_11 = arith.constant 0 : index
    %c0_12 = arith.constant 0 : index
    %6 = vector.load %arg8[%c0_11, %c0_12] : memref<16x256xf32, #tpu.memory_space<vmem>>, vector<16x256xf32>
    %c0_13 = arith.constant 0 : index
    %c0_14 = arith.constant 0 : index
    %c0_15 = arith.constant 0 : index
    %7 = vector.load %arg1[%c0_13, %c0_14, %c0_15] : memref<2x32x256xf32, #tpu.memory_space<vmem>>, vector<1x32x256xf32>
    %8 = vector.shape_cast %7 : vector<1x32x256xf32> to vector<32x256xf32>
    %cst = arith.constant dense<0.000000e+00> : vector<32x32xf32>
    %9 = tpu.matmul %8, %0, %cst {dimension_numbers = #tpu.dot_dimension_numbers<[1], [0], [0], [1], [0, 0, 1, 1], [], []>} : vector<32x256xf32>, vector<256x32xf32>, vector<32x32xf32> -> vector<32x32xf32>
    %10 = vector.broadcast %1 : vector<1x32xf32> to vector<32x32xf32>
    %11 = arith.mulf %9, %10 : vector<32x32xf32>
    %cst_16 = arith.constant dense<0.000000e+00> : vector<2x32xf32>
    %12 = tpu.matmul %2, %11, %cst_16 {dimension_numbers = #tpu.dot_dimension_numbers<[1], [0], [0], [1], [0, 0, 1, 1], [], []>} : vector<2x32xf32>, vector<32x32xf32>, vector<2x32xf32> -> vector<2x32xf32>
    %cst_17 = arith.constant 0.000000e+00 : f32
    %13 = vector.broadcast %cst_17 : f32 to vector<2x32xf32>
    %14 = arith.maximumf %12, %13 : vector<2x32xf32>
    %15 = vector.extract_strided_slice %14 {offsets = [0, 0], sizes = [2, 16], strides = [1, 1]} : vector<2x32xf32> to vector<2x16xf32>
    %cst_18 = arith.constant dense<0.000000e+00> : vector<32x16xf32>
    %16 = tpu.matmul %3, %15, %cst_18 {dimension_numbers = #tpu.dot_dimension_numbers<[1], [0], [0], [1], [0, 0, 1, 1], [], []>} : vector<32x2xf32>, vector<2x16xf32>, vector<32x16xf32> -> vector<32x16xf32>
    %17 = arith.negf %16 : vector<32x16xf32>
    %18 = math.exp %17 : vector<32x16xf32>
    %cst_19 = arith.constant 1.000000e+00 : f32
    %19 = vector.broadcast %cst_19 : f32 to vector<32x16xf32>
    %20 = arith.addf %19, %18 : vector<32x16xf32>
    %21 = arith.divf %19, %20 : vector<32x16xf32>
    %22 = vector.extract_strided_slice %14 {offsets = [0, 16], sizes = [2, 16], strides = [1, 1]} : vector<2x32xf32> to vector<2x16xf32>
    %cst_20 = arith.constant dense<0.000000e+00> : vector<32x16xf32>
    %23 = tpu.matmul %4, %22, %cst_20 {dimension_numbers = #tpu.dot_dimension_numbers<[1], [0], [0], [1], [0, 0, 1, 1], [], []>} : vector<32x2xf32>, vector<2x16xf32>, vector<32x16xf32> -> vector<32x16xf32>
    %24 = arith.negf %23 : vector<32x16xf32>
    %25 = math.exp %24 : vector<32x16xf32>
    %cst_21 = arith.constant 1.000000e+00 : f32
    %26 = vector.broadcast %cst_21 : f32 to vector<32x16xf32>
    %27 = arith.addf %26, %25 : vector<32x16xf32>
    %28 = arith.divf %26, %27 : vector<32x16xf32>
    %cst_22 = arith.constant dense<0.000000e+00> : vector<32x256xf32>
    %29 = tpu.matmul %21, %5, %cst_22 {dimension_numbers = #tpu.dot_dimension_numbers<[1], [0], [0], [1], [0, 0, 1, 1], [], []>} : vector<32x16xf32>, vector<16x256xf32>, vector<32x256xf32> -> vector<32x256xf32>
    %cst_23 = arith.constant dense<0.000000e+00> : vector<32x256xf32>
    %30 = tpu.matmul %28, %6, %cst_23 {dimension_numbers = #tpu.dot_dimension_numbers<[1], [0], [0], [1], [0, 0, 1, 1], [], []>} : vector<32x16xf32>, vector<16x256xf32>, vector<32x256xf32> -> vector<32x256xf32>
    %31 = arith.mulf %29, %30 : vector<32x256xf32>
    %c0_24 = arith.constant 0 : index
    %c0_25 = arith.constant 0 : index
    %c0_26 = arith.constant 0 : index
    %32 = vector.load %arg1[%c0_24, %c0_25, %c0_26] : memref<2x32x256xf32, #tpu.memory_space<vmem>>, vector<1x32x256xf32>
    %33 = vector.shape_cast %32 : vector<1x32x256xf32> to vector<32x256xf32>
    %34 = arith.mulf %33, %31 : vector<32x256xf32>
    %c0_27 = arith.constant 0 : index
    %c0_28 = arith.constant 0 : index
    %c0_29 = arith.constant 0 : index
    %35 = vector.load %arg9[%c0_27, %c0_28, %c0_29] : memref<2x32x256xf32, #tpu.memory_space<vmem>>, vector<1x32x256xf32>
    %36 = vector.shape_cast %35 : vector<1x32x256xf32> to vector<32x256xf32>
    %37 = vector.shape_cast %34 : vector<32x256xf32> to vector<1x32x256xf32>
    tpu.vector_store %arg9[%c0_27, %c0_28, %c0_29], %37 {strides = array<i32>} : memref<2x32x256xf32, #tpu.memory_space<vmem>>, vector<1x32x256xf32>,
    %c1 = arith.constant 1 : index
    %c0_30 = arith.constant 0 : index
    %c0_31 = arith.constant 0 : index
    %38 = vector.load %arg1[%c1, %c0_30, %c0_31] : memref<2x32x256xf32, #tpu.memory_space<vmem>>, vector<1x32x256xf32>
    %39 = vector.shape_cast %38 : vector<1x32x256xf32> to vector<32x256xf32>
    %cst_32 = arith.constant dense<0.000000e+00> : vector<32x32xf32>
    %40 = tpu.matmul %39, %0, %cst_32 {dimension_numbers = #tpu.dot_dimension_numbers<[1], [0], [0], [1], [0, 0, 1, 1], [], []>} : vector<32x256xf32>, vector<256x32xf32>, vector<32x32xf32> -> vector<32x32xf32>
    %41 = vector.broadcast %1 : vector<1x32xf32> to vector<32x32xf32>
    %42 = arith.mulf %40, %41 : vector<32x32xf32>
    %cst_33 = arith.constant dense<0.000000e+00> : vector<2x32xf32>
    %43 = tpu.matmul %2, %42, %cst_33 {dimension_numbers = #tpu.dot_dimension_numbers<[1], [0], [0], [1], [0, 0, 1, 1], [], []>} : vector<2x32xf32>, vector<32x32xf32>, vector<2x32xf32> -> vector<2x32xf32>
    %cst_34 = arith.constant 0.000000e+00 : f32
    %44 = vector.broadcast %cst_34 : f32 to vector<2x32xf32>
    %45 = arith.maximumf %43, %44 : vector<2x32xf32>
    %46 = vector.extract_strided_slice %45 {offsets = [0, 0], sizes = [2, 16], strides = [1, 1]} : vector<2x32xf32> to vector<2x16xf32>
    %cst_35 = arith.constant dense<0.000000e+00> : vector<32x16xf32>
    %47 = tpu.matmul %3, %46, %cst_35 {dimension_numbers = #tpu.dot_dimension_numbers<[1], [0], [0], [1], [0, 0, 1, 1], [], []>} : vector<32x2xf32>, vector<2x16xf32>, vector<32x16xf32> -> vector<32x16xf32>
    %48 = arith.negf %47 : vector<32x16xf32>
    %49 = math.exp %48 : vector<32x16xf32>
    %cst_36 = arith.constant 1.000000e+00 : f32
    %50 = vector.broadcast %cst_36 : f32 to vector<32x16xf32>
    %51 = arith.addf %50, %49 : vector<32x16xf32>
    %52 = arith.divf %50, %51 : vector<32x16xf32>
    %53 = vector.extract_strided_slice %45 {offsets = [0, 16], sizes = [2, 16], strides = [1, 1]} : vector<2x32xf32> to vector<2x16xf32>
    %cst_37 = arith.constant dense<0.000000e+00> : vector<32x16xf32>
    %54 = tpu.matmul %4, %53, %cst_37 {dimension_numbers = #tpu.dot_dimension_numbers<[1], [0], [0], [1], [0, 0, 1, 1], [], []>} : vector<32x2xf32>, vector<2x16xf32>, vector<32x16xf32> -> vector<32x16xf32>
    %55 = arith.negf %54 : vector<32x16xf32>
    %56 = math.exp %55 : vector<32x16xf32>
    %cst_38 = arith.constant 1.000000e+00 : f32
    %57 = vector.broadcast %cst_38 : f32 to vector<32x16xf32>
    %58 = arith.addf %57, %56 : vector<32x16xf32>
    %59 = arith.divf %57, %58 : vector<32x16xf32>
    %cst_39 = arith.constant dense<0.000000e+00> : vector<32x256xf32>
    %60 = tpu.matmul %52, %5, %cst_39 {dimension_numbers = #tpu.dot_dimension_numbers<[1], [0], [0], [1], [0, 0, 1, 1], [], []>} : vector<32x16xf32>, vector<16x256xf32>, vector<32x256xf32> -> vector<32x256xf32>
    %cst_40 = arith.constant dense<0.000000e+00> : vector<32x256xf32>
    %61 = tpu.matmul %59, %6, %cst_40 {dimension_numbers = #tpu.dot_dimension_numbers<[1], [0], [0], [1], [0, 0, 1, 1], [], []>} : vector<32x16xf32>, vector<16x256xf32>, vector<32x256xf32> -> vector<32x256xf32>
    %62 = arith.mulf %60, %61 : vector<32x256xf32>
    %c1_41 = arith.constant 1 : index
    %c0_42 = arith.constant 0 : index
    %c0_43 = arith.constant 0 : index
    %63 = vector.load %arg1[%c1_41, %c0_42, %c0_43] : memref<2x32x256xf32, #tpu.memory_space<vmem>>, vector<1x32x256xf32>
    %64 = vector.shape_cast %63 : vector<1x32x256xf32> to vector<32x256xf32>
    %65 = arith.mulf %64, %62 : vector<32x256xf32>
    %c1_44 = arith.constant 1 : index
    %c0_45 = arith.constant 0 : index
    %c0_46 = arith.constant 0 : index
    %66 = vector.load %arg9[%c1_44, %c0_45, %c0_46] : memref<2x32x256xf32, #tpu.memory_space<vmem>>, vector<1x32x256xf32>
    %67 = vector.shape_cast %66 : vector<1x32x256xf32> to vector<32x256xf32>
    %68 = vector.shape_cast %65 : vector<32x256xf32> to vector<1x32x256xf32>
    tpu.vector_store %arg9[%c1_44, %c0_45, %c0_46], %68 {strides = array<i32>} : memref<2x32x256xf32, #tpu.memory_space<vmem>>, vector<1x32x256xf32>,
    return
  }
  func.func @transform_0(%arg0: i32) -> (i32, i32, i32) {
    %c0_i32 = arith.constant 0 : i32
    %c0_i32_0 = arith.constant 0 : i32
    %c0_i32_1 = arith.constant 0 : i32
    return %arg0, %c0_i32, %c0_i32_0 : i32, i32, i32
  }
  func.func @transform_1(%arg0: i32) -> (i32, i32) {
    %c0_i32 = arith.constant 0 : i32
    %c0_i32_0 = arith.constant 0 : i32
    %c0_i32_1 = arith.constant 0 : i32
    return %c0_i32, %c0_i32_0 : i32, i32
  }
  func.func @transform_2(%arg0: i32) -> (i32, i32) {
    %c0_i32 = arith.constant 0 : i32
    %c0_i32_0 = arith.constant 0 : i32
    %c0_i32_1 = arith.constant 0 : i32
    return %c0_i32, %c0_i32_0 : i32, i32
  }
  func.func @transform_3(%arg0: i32) -> (i32, i32) {
    %c0_i32 = arith.constant 0 : i32
    %c0_i32_0 = arith.constant 0 : i32
    %c0_i32_1 = arith.constant 0 : i32
    return %c0_i32, %c0_i32_0 : i32, i32
  }
  func.func @transform_4(%arg0: i32) -> (i32, i32) {
    %c0_i32 = arith.constant 0 : i32
    %c0_i32_0 = arith.constant 0 : i32
    %c0_i32_1 = arith.constant 0 : i32
    return %c0_i32, %c0_i32_0 : i32, i32
  }
  func.func @transform_5(%arg0: i32) -> (i32, i32) {
    %c0_i32 = arith.constant 0 : i32
    %c0_i32_0 = arith.constant 0 : i32
    %c0_i32_1 = arith.constant 0 : i32
    return %c0_i32, %c0_i32_0 : i32, i32
  }
  func.func @transform_6(%arg0: i32) -> (i32, i32) {
    %c0_i32 = arith.constant 0 : i32
    %c0_i32_0 = arith.constant 0 : i32
    %c0_i32_1 = arith.constant 0 : i32
    return %c0_i32, %c0_i32_0 : i32, i32
  }
  func.func @transform_7(%arg0: i32) -> (i32, i32) {
    %c0_i32 = arith.constant 0 : i32
    %c0_i32_0 = arith.constant 0 : i32
    %c0_i32_1 = arith.constant 0 : i32
    return %c0_i32, %c0_i32_0 : i32, i32
  }
  func.func @transform_8(%arg0: i32) -> (i32, i32, i32) {
    %c0_i32 = arith.constant 0 : i32
    %c0_i32_0 = arith.constant 0 : i32
    %c0_i32_1 = arith.constant 0 : i32
    return %arg0, %c0_i32, %c0_i32_0 : i32, i32, i32
  }
}

</mosaic_0001>

<bundles_post_ra>
// kernel: tpu_custom_call.1
= control target key start
LH: loop header
LB: loop body
LE: loop exit
PB: predicated region body
PF: predicated region fallthrough
CT: control target
= control target key end

     0   :  { %s2269_s0 = inlined_call_operand.vmem [shape: f32[2,32,256], index: 0, kind: input, shape index: {}]   ;;  %s2270_s1 = inlined_call_operand.vmem [shape: f32[2,32], index: 1, kind: input, shape index: {}]   ;;  %s2271_s2 = inlined_call_operand.vmem [shape: f32[32,2], index: 2, kind: input, shape index: {}]   ;;  %s2272_s3 = inlined_call_operand.vmem [shape: f32[32,2], index: 3, kind: input, shape index: {}]   ;;  %s2273_s4 = inlined_call_operand.vmem [shape: f32[256,32], index: 4, kind: input, shape index: {}]   ;;  %s2274_s5 = inlined_call_operand.vmem [shape: f32[1,32], index: 5, kind: input, shape index: {}]   ;;  %s2275_s6 = inlined_call_operand.vmem [shape: f32[16,256], index: 6, kind: input, shape index: {}]   ;;  %s2276_s7 = inlined_call_operand.vmem [shape: f32[16,256], index: 7, kind: input, shape index: {}]   ;;  %s2277_s8 = inlined_call_operand.hbm [shape: f32[2,32,256], index: 8, kind: output, shape index: {}]  }
   0x1   :  { %v46_v0 = vld [vmem:[%s2273_s4 + $0x80] sm:$0xff]  ;;  %v47_v1 = vld [vmem:[%s2273_s4 + $0x88] sm:$0xff]  ;;  %v48_v5 = vld [vmem:[%s2273_s4 + $0x90] sm:$0xff] }
   0x2   :  { %v30_v2 = vld [vmem:[%s2273_s4] sm:$0xff]  ;;  %v1856_v3 = vpack.c.bf16 %v47_v1, %v46_v0  ;;  %v31_v4 = vld [vmem:[%s2273_s4 + $0x8] sm:$0xff]  ;;  %v49_v6 = vld [vmem:[%s2273_s4 + $0x98] sm:$0xff] }
   0x3   :  { %v1867_v7 = vpack.c.bf16 %v31_v4, %v30_v2  ;;  %v1869_v8 = vpack.c.bf16 %v49_v6, %v48_v5  ;;  %v32_v9 = vld [vmem:[%s2273_s4 + $0x10] sm:$0xff]  ;;  %v33_v10 = vld [vmem:[%s2273_s4 + $0x18] sm:$0xff]  ;;  %v50_v11 = vld [vmem:[%s2273_s4 + $0xa0] sm:$0xff] }
   0x4   :  { %1609 = vmatprep.subr.bf16.mxu0 %v1856_v3  ;;  %v51_v12 = vld [vmem:[%s2273_s4 + $0xa8] sm:$0xff]  ;;  %v1885_v13 = vpack.c.bf16 %v33_v10, %v32_v9  ;;  %v34_v15 = vld [vmem:[%s2273_s4 + $0x20] sm:$0xff]  ;;  %v52_v17 = vld [vmem:[%s2273_s4 + $0xb0] sm:$0xff] }
   0x5   :  { %1611 = vmatpush3.bf16.msra.mxu0 %v1867_v7  ;;  %v1888_v14 = vpack.c.bf16 %v51_v12, %v50_v11  ;;  %v35_v16 = vld [vmem:[%s2273_s4 + $0x28] sm:$0xff]  ;;  %v53_v18 = vld [vmem:[%s2273_s4 + $0xb8] sm:$0xff]  ;;  %v36_v21 = vld [vmem:[%s2273_s4 + $0x30] sm:$0xff] }
   0x6   :  { %1613 = vmatprep.subr.bf16.mxu0 %v1869_v8  ;;  %v1618_v19 = vpack.c.bf16 %v35_v16, %v34_v15  ;;  %v1620_v20 = vpack.c.bf16 %v53_v18, %v52_v17  ;;  %v37_v22 = vld [vmem:[%s2273_s4 + $0x38] sm:$0xff]  ;;  %v54_v23 = vld [vmem:[%s2273_s4 + $0xc0] sm:$0xff]  ;;  %v55_v24 = vld [vmem:[%s2273_s4 + $0xc8] sm:$0xff] }
   0x7   :  { %v1919_v25 = vld [vmem:[%s2269_s0 + $0x8] sm:$0xff]  ;;  %v1622_v26 = vpack.c.bf16 %v37_v22, %v36_v21  ;;  %v1624_v27 = vpack.c.bf16 %v55_v24, %v54_v23  ;;  %v38_v28 = vld [vmem:[%s2273_s4 + $0x40] sm:$0xff] }
   0x8   :  { %152 = vmatprep.mubr.f32.mxu0 %v1919_v25  ;;  %v39_v29 = vld [vmem:[%s2273_s4 + $0x48] sm:$0xff] }
   0x9   :  { %1615 = vmatpush3.bf16.msra.mxu0 %v1885_v13 }
   0xa   :  { %1617 = vmatprep.subr.bf16.mxu0 %v1888_v14 }
   0xd   :  { %1619 = vmatpush3.bf16.msra.mxu0 %v1618_v19 }
   0xe   :  { %1621 = vmatprep.subr.bf16.mxu0 %v1620_v20 }
   0xf   :  { %13 = vsyncpa [#allocation3], 0  ;;  %v56_v30 = vld [vmem:[%s2273_s4 + $0xd0] sm:$0xff]  ;;  %v57_v31 = vld [vmem:[%s2273_s4 + $0xd8] sm:$0xff]  ;;  %v1626_v32 = vpack.c.bf16 %v39_v29, %v38_v28  ;;  %v1795_v56 = vmov 0.0|0.0   ;;  %vm1796_vm0 = vmmov 0  }
  0x10   :  { %v1628_v33 = vpack.c.bf16 %v57_v31, %v56_v30  ;;  %v40_v34 = vld [vmem:[%s2273_s4 + $0x50] sm:$0xff]  ;;  %v41_v35 = vld [vmem:[%s2273_s4 + $0x58] sm:$0xff]  ;;  %v58_v36 = vld [vmem:[%s2273_s4 + $0xe0] sm:$0xff]  ;;  %1640 = vmatprep.subr.bf16.mxu1 %v1795_v56  ;;  %v1797_v57 = vmov 0.0   ;;  %vm183_vm1 = vcmask 261120   ;;  %vm258_vm2 = vcmask 15360  }
  0x11   :  { %1623 = vmatpush3.bf16.msra.mxu0 %v1622_v26  ;;  %v59_v37 = vld [vmem:[%s2273_s4 + $0xe8] sm:$0xff]  ;;  %v1630_v38 = vpack.c.bf16 %v41_v35, %v40_v34  ;;  %v42_v40 = vld [vmem:[%s2273_s4 + $0x60] sm:$0xff]  ;;  %v60_v42 = vld [vmem:[%s2273_s4 + $0xf0] sm:$0xff]  ;;  %1562 = vmatprep.mubr.msk.f32.mxu1 %vm1796_vm0, %v1797_v57  ;;  %vm271_vm3 = vcmask 1041408   ;;  %s1798_s11 = smov 112   ;;  %vm509_vm4 = vcmask 130048  }
  0x12   :  { %1625 = vmatprep.subr.bf16.mxu0 %v1624_v27  ;;  %v1632_v39 = vpack.c.bf16 %v59_v37, %v58_v36  ;;  %v43_v41 = vld [vmem:[%s2273_s4 + $0x68] sm:$0xff]  ;;  %v61_v43 = vld [vmem:[%s2273_s4 + $0xf8] sm:$0xff]  ;;  %v44_v46 = vld [vmem:[%s2273_s4 + $0x70] sm:$0xff] }
  0x13   :  { %v1634_v44 = vpack.c.bf16 %v43_v41, %v42_v40  ;;  %v1636_v45 = vpack.c.bf16 %v61_v43, %v60_v42  ;;  %v45_v47 = vld [vmem:[%s2273_s4 + $0x78] sm:$0xff]  ;;  %v1967_v49 = vld [vmem:[%s2269_s0] sm:$0xff]  ;;  %v1980_v51 = vld [vmem:[%s2269_s0 + $0x10] sm:$0xff] }
  0x14   :  { %v1638_v48 = vpack.c.bf16 %v45_v47, %v44_v46  ;;  %v1972_v50 = vld [vmem:[%s2269_s0 + $0x18] sm:$0xff]  ;;  %v1986_v52 = vld [vmem:[%s2269_s0 + $0x28] sm:$0xff]  ;;  %v1994_v53 = vld [vmem:[%s2269_s0 + $0x20] sm:$0xff] }
  0x15   :  { %1627 = vmatpush3.bf16.msra.mxu0 %v1626_v32  ;;  %v2000_v54 = vld [vmem:[%s2269_s0 + $0x38] sm:$0xff]  ;;  %v2008_v55 = vld [vmem:[%s2269_s0 + $0x30] sm:$0xff]  ;;  %v2017_v62 = vld [vmem:[%s2274_s5] ss:$0 sm:$0xff] }
  0x16   :  { %1629 = vmatprep.subr.bf16.mxu0 %v1628_v33  ;;  %v2041_v15 = vld [vmem:[%s2269_s0 + $0x48] sm:$0xff]  ;;  %v2046_v16 = vld [vmem:[%s2269_s0 + $0x40] sm:$0xff]  ;;  %v2051_v17 = vld [vmem:[%s2269_s0 + $0x58] sm:$0xff] }
  0x17   :  { %v2059_v18 = vld [vmem:[%s2269_s0 + $0x50] sm:$0xff]  ;;  %v2064_v22 = vld [vmem:[%s2269_s0 + $0x68] sm:$0xff]  ;;  %v2098_v28 = vld [vmem:[%s2271_s2 + $0x18] sm:$0xff] }
  0x18   :  { %v2069_v23 = vld [vmem:[%s2271_s2 + $0x8] sm:$0xff]  ;;  %v2077_v24 = vld [vmem:[%s2271_s2 + $0x10] sm:$0xff]  ;;  %v2104_v29 = vld [vmem:[%s2272_s3] sm:$0xff] }
  0x19   :  { %1631 = vmatpush3.bf16.msra.mxu0 %v1630_v38  ;;  %v2110_v30 = vld [vmem:[%s2269_s0 + $0x70] sm:$0xff]  ;;  %v2137_v34 = vld [vmem:[%s2272_s3 + $0x18] sm:$0xff]  ;;  %v73_v35 = vld [vmem:[%s2275_s6 + $0x8] sm:$0xff] }
  0x1a   :  { %1633 = vmatprep.subr.bf16.mxu0 %v1632_v39  ;;  %v75_v36 = vld [vmem:[%s2275_s6 + $0x18] sm:$0xff] }
  0x1b   :  { %v1646_v37 = vpack.c.bf16 %v75_v36, %v73_v35 }
  0x1d   :  { %1635 = vmatpush3.bf16.msra.mxu0 %v1634_v44 }
  0x1e   :  { %1637 = vmatprep.subr.bf16.mxu0 %v1636_v45 }
  0x21   :  { %1639 = vmatpush3.bf16.msra.mxu0 %v1638_v48 }
  0x22   :  { %1655 = vmatprep.subr.bf16.mxu0 %v1856_v3 }
  0x24   :  { %153 = vmatmul.mubr.f32.vlgmr.msra.gmra.mrb[0].mxu0 %v1967_v49 }
  0x25   :  { %157 = vmatprep.mubr.f32.mxu0 %v1972_v50  ;;  %1657 = vmatpush3.bf16.msra.mxu0 %v1867_v7 }
  0x26   :  { %1659 = vmatprep.subr.bf16.mxu0 %v1869_v8 }
  0x28   :  { %158 = vmatmul.mubr.f32.gmra.mrb[2].mxu0 %v1980_v51 }
  0x29   :  { %162 = vmatprep.mubr.f32.mxu0 %v1986_v52  ;;  %1661 = vmatpush3.bf16.msra.mxu0 %v1885_v13  ;;  %v2027_v13 = vld [vmem:[%s2270_s1] sm:$0x3] }
  0x2a   :  { %1663 = vmatprep.subr.bf16.mxu0 %v1888_v14  ;;  %v2034_v14 = vld [vmem:[%s2271_s2] sm:$0xff] }
  0x2c   :  { %163 = vmatmul.mubr.f32.gmra.mrb[4].mxu0 %v1994_v53 }
  0x2d   :  { %167 = vmatprep.mubr.f32.mxu0 %v2000_v54  ;;  %1665 = vmatpush3.bf16.msra.mxu0 %v1618_v19 }
  0x2e   :  { %1667 = vmatprep.subr.bf16.mxu0 %v1620_v20 }
  0x30   :  { %168 = vmatmul.mubr.f32.gmra.mrb[6].mxu0 %v2008_v55 }
  0x31   :  { %1669 = vmatpush3.bf16.msra.mxu0 %v1622_v26  ;;  %809 = vmatprep.mubr.f32.mxu0 %v2041_v15  ;;  %v2082_v26 = vld [vmem:[%s2269_s0 + $0x60] sm:$0xff] }
  0x32   :  { %1671 = vmatprep.subr.bf16.mxu0 %v1624_v27  ;;  %v2089_v27 = vld [vmem:[%s2269_s0 + $0x78] sm:$0xff] }
  0x35   :  { %1673 = vmatpush3.bf16.msra.mxu0 %v1626_v32  ;;  %v2121_v32 = vld [vmem:[%s2272_s3 + $0x8] sm:$0xff] }
  0x36   :  { %1675 = vmatprep.subr.bf16.mxu0 %v1628_v33  ;;  %v2127_v33 = vld [vmem:[%s2272_s3 + $0x10] sm:$0xff] }
  0x39   :  { %1677 = vmatpush3.bf16.msra.mxu0 %v1630_v38  ;;  %v72_v38 = vld [vmem:[%s2275_s6] sm:$0xff] }
  0x3a   :  { %1679 = vmatprep.subr.bf16.mxu0 %v1632_v39  ;;  %v74_v39 = vld [vmem:[%s2275_s6 + $0x10] sm:$0xff] }
  0x3b   :  { %v1648_v40 = vpack.c.bf16 %v74_v39, %v72_v38 }
  0x3d   :  { %1681 = vmatpush3.bf16.msra.mxu0 %v1634_v44 }
  0x3e   :  { %1683 = vmatprep.subr.bf16.mxu0 %v1636_v45 }
  0x41   :  { %1685 = vmatpush3.bf16.msra.mxu0 %v1638_v48 }
  0x42   :  { %1693 = vmatprep.subr.bf16.mxu0 %v1646_v37 }
  0x44   :  { %810 = vmatmul.mubr.f32.vlgmr.msra.gmra.mrb[8].mxu0 %v2046_v16 }
  0x45   :  { %814 = vmatprep.mubr.f32.mxu0 %v2051_v17  ;;  %1695 = vmatpush1.bf16.msra.mxu0 %v1648_v40 }
  0x48   :  { %815 = vmatmul.mubr.f32.gmra.mrb[10].mxu0 %v2059_v18 }
  0x49   :  { %819 = vmatprep.mubr.f32.mxu0 %v2064_v22 }
  0x4c   :  { %820 = vmatmul.mubr.f32.gmra.mrb[12].mxu0 %v2082_v26 }
  0x4d   :  { %824 = vmatprep.mubr.f32.mxu0 %v2089_v27 }
  0x50   :  { %825 = vmatmul.mubr.f32.gmra.mrb[14].mxu0 %v2110_v30 }
  0x51   :  { %1206 = vmatprep.mubr.f32.mxu0 %v1797_v57 }
  0xf7   :  { %v1468_v58 = vpop.f32.mrb[0].mxu0 }
  0xf8   :  { %v1469_v59 = vpop.f32.mrb[1].mxu0 }
  0xf9   :  { %v1470_v60 = vadd.f32 %v1469_v59, %v1468_v58 }
  0xfb   :  { %v1471_v61 = vpop.f32.mrb[2].mxu0  ;;  %v179_v1 = vmul.f32 %v1470_v60, %v2017_v62  ;;  %v77_v60 = vld [vmem:[%s2276_s7 + $0x8] sm:$0xff] }
  0xfc   :  { %v1472_v63 = vpop.f32.mrb[3].mxu0 }
  0xfd   :  { %v1473_v0 = vadd.f32 %v1472_v63, %v1471_v61  ;;  %v79_v61 = vld [vmem:[%s2276_s7 + $0x18] sm:$0xff] }
  0xff   :  { %v180_v2 = vmul.f32 %v1473_v0, %v2017_v62  ;;  %v1474_v3 = vpop.f32.mrb[4].mxu0  ;;  %v2160_v0 = vpack.c.bf16 %v79_v61, %v77_v60 }
 0x100   :  { %v1475_v4 = vpop.f32.mrb[5].mxu0 }
 0x101   :  { %v1476_v5 = vadd.f32 %v1475_v4, %v1474_v3  ;;  %v1641_v6 = vpack.c.bf16 %v180_v2, %v179_v1 }
 0x103   :  { %v1477_v7 = vpop.f32.mrb[6].mxu0  ;;  %1642 = vmatpush3.bf16.msra.mxu1 %v1641_v6  ;;  %v181_v10 = vmul.f32 %v1476_v5, %v2017_v62 }
 0x104   :  { %v1478_v8 = vpop.f32.mrb[7].mxu0  ;;  %1643 = vmatprep.subr.bf16.mxu1 %v1795_v56 }
 0x105   :  { %v1479_v9 = vadd.f32 %v1478_v8, %v1477_v7 }
 0x107   :  { %v182_v11 = vmul.f32 %v1479_v9, %v2017_v62 }
 0x109   :  { %v1644_v12 = vpack.c.bf16 %v182_v11, %v181_v10 }
 0x10b   :  { %1645 = vmatpush3.bf16.msra.mxu1 %v1644_v12 }
 0x10e   :  { %1563 = vmatmul.mubr.msk.f32.vlgmr.msra.gmra.mrb[0].mxu1 %vm183_vm1, %v2027_v13 }
 0x10f   :  { %1567 = vmatprep.mubr.msk.f32.mxu1 %vm258_vm2, %v2034_v14 }
 0x117   :  { %v1527_v47 = vpop.f32.mrb[8].mxu0 }
 0x118   :  { %v1528_v59 = vpop.f32.mrb[9].mxu0 }
 0x119   :  { %v1529_v1 = vadd.f32 %v1528_v59, %v1527_v47 }
 0x11b   :  { %v1530_v63 = vpop.f32.mrb[10].mxu0  ;;  %v2164_v5 = vmul.f32 %v1529_v1, %v2017_v62 }
 0x11c   :  { %v1531_v2 = vpop.f32.mrb[11].mxu0 }
 0x11d   :  { %v1532_v3 = vadd.f32 %v1531_v2, %v1530_v63 }
 0x11f   :  { %v1533_v4 = vpop.f32.mrb[12].mxu0  ;;  %v2167_v7 = vmul.f32 %v1532_v3, %v2017_v62 }
 0x120   :  { %v1534_v6 = vpop.f32.mrb[13].mxu0 }
 0x121   :  { %v1535_v8 = vadd.f32 %v1534_v6, %v1533_v4  ;;  %v1687_v10 = vpack.c.bf16 %v2167_v7, %v2164_v5 }
 0x1e1   :  { %v253_v19 = vpop.f32.mrb[0].mxu1 }
 0x1e2   :  { %v257_v20 = vmax.f32 %v253_v19, 0.0  ;;  %v1564_v21 = vpop.f32.mrb[1].mxu1 }
 0x1e4   :  { %384 = vrot.lane.b32.xlu0 %v257_v20, %s1798_s11  ;;  %1565 = vmatprep.subr.msk.mxu1 %vm271_vm3, %v257_v20 }
 0x1e5   :  { %1566 = vmatpush3.msk.msra.mxu1 %vm271_vm3, %v257_v20  ;;  %v1536_v20 = vpop.f32.mrb[14].mxu0 }
 0x1e6   :  { %1568 = vmatmul.mubr.msk.f32.vlgmr.msra.gmra.mrb[2].mxu1 %vm258_vm2, %v2069_v23  ;;  %v1537_v21 = vpop.f32.mrb[15].mxu0 }
 0x1e7   :  { %1570 = vmatprep.mubr.msk.f32.mxu1 %vm258_vm2, %v2077_v24  ;;  %v1538_v35 = vadd.f32 %v1537_v21, %v1536_v20 }
 0x1e9   :  { %v833_v38 = vmul.f32 %v1538_v35, %v2017_v62 }
 0x1ea   :  { %1571 = vmatmul.mubr.msk.f32.gmra.mrb[4].mxu1 %vm258_vm2, %v2098_v28 }
 0x1eb   :  { %1575 = vmatprep.mubr.msk.f32.mxu1 %vm258_vm2, %v2104_v29 }
 0x256   :  { %v385_v31 = vpop.permute.xlu0 %384 }
 0x257   :  { %1573 = vmatprep.subr.msk.mxu1 %vm271_vm3, %v385_v31 }
 0x258   :  { %1574 = vmatpush3.msk.msra.mxu1 %vm271_vm3, %v385_v31  ;;  %v832_v31 = vmul.f32 %v1535_v8, %v2017_v62 }
 0x259   :  { %1576 = vmatmul.mubr.msk.f32.vlgmr.msra.gmra.mrb[6].mxu1 %vm258_vm2, %v2121_v32  ;;  %1647 = vmatprep.subr.bf16.mxu1 %v1646_v37 }
 0x25a   :  { %1578 = vmatprep.mubr.msk.f32.mxu1 %vm258_vm2, %v2127_v33  ;;  %1649 = vmatpush1.bf16.msra.mxu1 %v1648_v40  ;;  %v1690_v40 = vpack.c.bf16 %v833_v38, %v832_v31 }
 0x25b   :  { %1651 = vmatprep.subr.bf16.mxu1 %v2160_v0 }
 0x25d   :  { %1579 = vmatmul.mubr.msk.f32.gmra.mrb[8].mxu1 %vm258_vm2, %v2137_v34 }
 0x25e   :  { %586 = vmatprep.mubr.f32.mxu1 %v1797_v57 }
 0x2b9   :  { %v1569_v41 = vpop.f32.mrb[2].mxu1 }
 0x2ba   :  { %v1381_v42 = vmul.f32 -1.442695, %v1569_v41  ;;  %v341_v43 = vpop.f32.mrb[3].mxu1  ;;  %v76_v41 = vld [vmem:[%s2276_s7] sm:$0xff] }
 0x2bb   :  { %v1380_v44 = vmul.f32 -1.442695, %v341_v43 }
 0x2bc   :  { %1707 = vpow2.f32 %v1381_v42  ;;  %v78_v42 = vld [vmem:[%s2276_s7 + $0x10] sm:$0xff]  ;;  %s1799_s7 = smov [#allocation2]  }
 0x2bd   :  { %1709 = vpow2.f32 %v1380_v44  ;;  %v1572_v45 = vpop.f32.mrb[4].mxu1  ;;  %v2179_v44 = vpack.c.bf16 %v78_v42, %v76_v41 }
 0x2be   :  { %v351_v46 = vpop.f32.mrb[5].mxu1  ;;  %v1383_v48 = vmul.f32 -1.442695, %v1572_v45 }
 0x2bf   :  { %v1382_v58 = vmul.f32 -1.442695, %v351_v46 }
 0x2c1   :  { %1711 = vpow2.f32 %v1382_v58 }
 0x2c2   :  { %1713 = vpow2.f32 %v1383_v48 }
 0x2c6   :  { %v1708_v9 = vpop.eup %1707 }
 0x2c7   :  { %v1710_v11 = vpop.eup %1709  ;;  %v373_v12 = vadd.f32 1.0, %v1708_v9 }
 0x2c8   :  { %v372_v19 = vadd.f32 1.0, %v1710_v11 }
 0x2ca   :  { %1715 = vrcp.f32 %v372_v19 }
 0x2cb   :  { %v1712_v36 = vpop.eup %1711  ;;  %1717 = vrcp.f32 %v373_v12 }
 0x2cc   :  { %v374_v37 = vadd.f32 1.0, %v1712_v36  ;;  %v1714_v39 = vpop.eup %1713 }
 0x2cd   :  { %v375_v43 = vadd.f32 1.0, %v1714_v39 }
 0x2ce   :  { %1719 = vrcp.f32 %v374_v37 }
 0x2cf   :  { %1721 = vrcp.f32 %v375_v43 }
 0x2d4   :  { %v1716_v45 = vpop.eup %1715 }
 0x2d5   :  { %1393 = vmatmul.mubr.msk.f32.vlgmr.msra.gmra.mrb[10].mxu1 %vm509_vm4, %v1716_v45  ;;  %v1718_v62 = vpop.eup %1717 }
 0x2d6   :  { %592 = vmatprep.mubr.f32.mxu1 %v1797_v57  ;;  %1653 = vmatpush1.bf16.msra.mxu1 %v2179_v44 }
 0x2d7   :  { %1686 = vmatprep.subr.bf16.mxu1 %v1795_v56 }
 0x2d8   :  { %v1720_v46 = vpop.eup %1719 }
 0x2d9   :  { %1394 = vmatmul.mubr.msk.f32.gmra.mrb[12].mxu1 %vm509_vm4, %v1718_v62  ;;  %v1722_v47 = vpop.eup %1721 }
 0x2da   :  { %598 = vmatprep.mubr.f32.mxu1 %v1797_v57 }
 0x2dd   :  { %1395 = vmatmul.mubr.msk.f32.gmra.mrb[14].mxu1 %vm509_vm4, %v1720_v46 }
 0x2de   :  { %604 = vmatprep.mubr.f32.mxu1 %v1797_v57 }
 0x2e1   :  { %1396 = vmatmul.mubr.msk.f32.gmra.mrb[16].mxu1 %vm509_vm4, %v1722_v47 }
 0x2e2   :  { %687 = vmatprep.mubr.f32.mxu1 %v1797_v57 }
 0x32c   :  { %v1577_v48 = vpop.f32.mrb[6].mxu1 }
 0x32d   :  { %v1390_v58 = vmul.f32 -1.442695, %v1577_v48  ;;  %v466_v59 = vpop.f32.mrb[7].mxu1 }
 0x32e   :  { %v1389_v60 = vmul.f32 -1.442695, %v466_v59 }
 0x32f   :  { %1723 = vpow2.f32 %v1390_v58 }
 0x330   :  { %1725 = vpow2.f32 %v1389_v60  ;;  %v1580_v61 = vpop.f32.mrb[8].mxu1 }
 0x331   :  { %v476_v63 = vpop.f32.mrb[9].mxu1  ;;  %v1392_v2 = vmul.f32 -1.442695, %v1580_v61 }
 0x332   :  { %v1391_v1 = vmul.f32 -1.442695, %v476_v63 }
 0x334   :  { %1727 = vpow2.f32 %v1391_v1 }
 0x335   :  { %1729 = vpow2.f32 %v1392_v2 }
 0x339   :  { %v1724_v3 = vpop.eup %1723 }
 0x33a   :  { %v1726_v4 = vpop.eup %1725  ;;  %v498_v6 = vadd.f32 1.0, %v1724_v3 }
 0x33b   :  { %v497_v5 = vadd.f32 1.0, %v1726_v4 }
 0x33d   :  { %1731 = vrcp.f32 %v497_v5 }
 0x33e   :  { %v1728_v7 = vpop.eup %1727  ;;  %1733 = vrcp.f32 %v498_v6 }
 0x33f   :  { %v499_v8 = vadd.f32 1.0, %v1728_v7  ;;  %v1730_v9 = vpop.eup %1729 }
 0x340   :  { %v500_v11 = vadd.f32 1.0, %v1730_v9 }
 0x341   :  { %1735 = vrcp.f32 %v499_v8 }
 0x342   :  { %1737 = vrcp.f32 %v500_v11 }
 0x347   :  { %v1732_v12 = vpop.eup %1731 }
 0x348   :  { %1397 = vmatmul.mubr.msk.f32.vlgmr.msra.gmra.mrb[18].mxu1 %vm509_vm4, %v1732_v12  ;;  %v1734_v19 = vpop.eup %1733 }
 0x349   :  { %1688 = vmatpush3.bf16.msra.mxu1 %v1687_v10  ;;  %693 = vmatprep.mubr.f32.mxu1 %v1797_v57 }
 0x34a   :  { %1689 = vmatprep.subr.bf16.mxu1 %v1795_v56 }
 0x34b   :  { %v1736_v20 = vpop.eup %1735 }
 0x34c   :  { %1398 = vmatmul.mubr.msk.f32.gmra.mrb[20].mxu1 %vm509_vm4, %v1734_v19  ;;  %v1738_v21 = vpop.eup %1737 }
 0x34d   :  { %699 = vmatprep.mubr.f32.mxu1 %v1797_v57  ;;  %1691 = vmatpush3.bf16.msra.mxu1 %v1690_v40 }
 0x350   :  { %1399 = vmatmul.mubr.msk.f32.gmra.mrb[22].mxu1 %vm509_vm4, %v1736_v20 }
 0x351   :  { %705 = vmatprep.mubr.f32.mxu1 %v1797_v57 }
 0x354   :  { %1400 = vmatmul.mubr.msk.f32.gmra.mrb[24].mxu1 %vm509_vm4, %v1738_v21 }
 0x355   :  { %1589 = vmatprep.mubr.msk.f32.mxu1 %vm1796_vm0, %v1797_v57 }
 0x358   :  { %1590 = vmatmul.mubr.msk.f32.vlgmr.msra.gmra.mrb[26].mxu1 %vm183_vm1, %v2027_v13 }
 0x359   :  { %1594 = vmatprep.mubr.msk.f32.mxu1 %vm258_vm2, %v2034_v14 }
 0x3a8   :  { %v588_v56 = vpop.f32.mrb[10].mxu1 }
 0x3a9   :  { %v590_v10 = vpop.f32.mrb[11].mxu1 }
 0x3ac   :  { %v594_v31 = vpop.f32.mrb[12].mxu1 }
 0x3ad   :  { %v596_v35 = vpop.f32.mrb[13].mxu1 }
 0x3b0   :  { %v600_v36 = vpop.f32.mrb[14].mxu1 }
 0x3b1   :  { %v602_v37 = vpop.f32.mrb[15].mxu1 }
 0x3b4   :  { %v606_v38 = vpop.f32.mrb[16].mxu1 }
 0x3b5   :  { %v608_v39 = vpop.f32.mrb[17].mxu1 }
 0x41b   :  { %v689_v40 = vpop.f32.mrb[18].mxu1 }
 0x41c   :  { %v712_v41 = vmul.f32 %v689_v40, %v588_v56  ;;  %v691_v42 = vpop.f32.mrb[19].mxu1 }
 0x41d   :  { %v713_v43 = vmul.f32 %v691_v42, %v590_v10 }
 0x41e   :  { %v720_v45 = vmul.f32 %v712_v41, %v1967_v49 }
 0x41f   :  { %v721_v62 = vmul.f32 %v713_v43, %v1919_v25  ;;  %v695_v13 = vpop.f32.mrb[20].mxu1 }
 0x420   :  { %728 = vst [vmem:[#allocation2] sm:$0xff] %v720_v45  ;;  %v714_v46 = vmul.f32 %v695_v13, %v594_v31  ;;  %v697_v14 = vpop.f32.mrb[21].mxu1 }
 0x421   :  { %729 = vst [vmem:[#allocation2 + $0x8] sm:$0xff] %v721_v62  ;;  %v715_v47 = vmul.f32 %v697_v14, %v596_v35 }
 0x422   :  { %v722_v48 = vmul.f32 %v714_v46, %v1980_v51 }
 0x423   :  { %v723_v58 = vmul.f32 %v715_v47, %v1972_v50  ;;  %v701_v59 = vpop.f32.mrb[22].mxu1 }
 0x424   :  { %730 = vst [vmem:[#allocation2 + $0x10] sm:$0xff] %v722_v48  ;;  %v716_v60 = vmul.f32 %v701_v59, %v600_v36  ;;  %v703_v61 = vpop.f32.mrb[23].mxu1 }
 0x425   :  { %731 = vst [vmem:[#allocation2 + $0x18] sm:$0xff] %v723_v58  ;;  %v717_v63 = vmul.f32 %v703_v61, %v602_v37 }
 0x426   :  { %v724_v49 = vmul.f32 %v716_v60, %v1994_v53 }
 0x427   :  { %v725_v25 = vmul.f32 %v717_v63, %v1986_v52  ;;  %v707_v1 = vpop.f32.mrb[24].mxu1 }
 0x428   :  { %732 = vst [vmem:[#allocation2 + $0x20] sm:$0xff] %v724_v49  ;;  %v718_v2 = vmul.f32 %v707_v1, %v606_v38  ;;  %v709_v3 = vpop.f32.mrb[25].mxu1 }
 0x429   :  { %733 = vst [vmem:[#allocation2 + $0x28] sm:$0xff] %v725_v25  ;;  %v719_v4 = vmul.f32 %v709_v3, %v608_v39 }
 0x42a   :  { %v726_v51 = vmul.f32 %v718_v2, %v2008_v55 }
 0x42b   :  { %v727_v50 = vmul.f32 %v719_v4, %v2000_v54  ;;  %v900_v5 = vpop.f32.mrb[26].mxu1 }
 0x42c   :  { %734 = vst [vmem:[#allocation2 + $0x30] sm:$0xff] %v726_v51  ;;  %v904_v6 = vmax.f32 %v900_v5, 0.0  ;;  %v1591_v7 = vpop.f32.mrb[27].mxu1 }
 0x42d   :  { %735 = vst [vmem:[#allocation2 + $0x38] sm:$0xff] %v727_v50 }
 0x42e   :  { %1017 = vrot.lane.b32.xlu0 %v904_v6, %s1798_s11  ;;  %1592 = vmatprep.subr.msk.mxu1 %vm271_vm3, %v904_v6  ;;  %s1362_s11 = sshll.u32 %s1799_s7, 4  ;;  %s1363_s11 = int_to_ptr.vmem [resolvable:$true] %s1362_s11 }
 0x42f   :  { %1593 = vmatpush3.msk.msra.mxu1 %vm271_vm3, %v904_v6  ;;  %s1771_s18 = scalar_lea.vmem %s1363_s11, 2048  ;;  %p1776_p1 = scmp.lt.s32.totalorder %s1363_s11, %s1363_s11 }
 0x430   :  { %1595 = vmatmul.mubr.msk.f32.vlgmr.msra.gmra.mrb[28].mxu1 %vm258_vm2, %v2069_v23  ;;  %p1772_p0 = scmp.ne.s32.totalorder %s1363_s11, %s1771_s18  ;;  %p1777_p2 = scmp.lt.s32.totalorder %s1771_s18, %s1771_s18 }
 0x431   :  { %1597 = vmatprep.mubr.msk.f32.mxu1 %vm258_vm2, %v2077_v24 }
 0x432   :  { %p1778_p3 = por %p1777_p2, %p1776_p1 }
 0x434   :  { %1598 = vmatmul.mubr.msk.f32.gmra.mrb[30].mxu1 %vm258_vm2, %v2098_v28  ;;  %p1779_p4 = pnand %p1778_p3, %p1772_p0 }
 0x435   :  { %1602 = vmatprep.mubr.msk.f32.mxu1 %vm258_vm2, %v2104_v29 }
 0x4a0   :  { %v1018_v52 = vpop.permute.xlu0 %1017 }
 0x4a1   :  { %1600 = vmatprep.subr.msk.mxu1 %vm271_vm3, %v1018_v52 }
 0x4a2   :  { %1601 = vmatpush3.msk.msra.mxu1 %vm271_vm3, %v1018_v52 }
 0x4a3   :  { %1603 = vmatmul.mubr.msk.f32.vlgmr.msra.gmra.mrb[32].mxu1 %vm258_vm2, %v2121_v32  ;;  %1697 = vmatprep.subr.bf16.mxu1 %v2160_v0 }
 0x4a4   :  { %1605 = vmatprep.mubr.msk.f32.mxu1 %vm258_vm2, %v2127_v33  ;;  %1699 = vmatpush1.bf16.msra.mxu1 %v2179_v44 }
 0x4a7   :  { %1606 = vmatmul.mubr.msk.f32.gmra.mrb[34].mxu1 %vm258_vm2, %v2137_v34 }
 0x4a8   :  { %1307 = vmatprep.mubr.f32.mxu1 %v1797_v57 }
 0x503   :  { %v1596_v53 = vpop.f32.mrb[28].mxu1 }
 0x504   :  { %v1416_v54 = vmul.f32 -1.442695, %v1596_v53  ;;  %v974_v55 = vpop.f32.mrb[29].mxu1 }
 0x505   :  { %v1415_v23 = vmul.f32 -1.442695, %v974_v55 }
 0x506   :  { %1739 = vpow2.f32 %v1416_v54 }
 0x507   :  { %1741 = vpow2.f32 %v1415_v23  ;;  %v1599_v24 = vpop.f32.mrb[30].mxu1 }
 0x508   :  { %v984_v28 = vpop.f32.mrb[31].mxu1  ;;  %v1418_v29 = vmul.f32 -1.442695, %v1599_v24 }
 0x509   :  { %v1417_v32 = vmul.f32 -1.442695, %v984_v28 }
 0x50b   :  { %1743 = vpow2.f32 %v1417_v32 }
 0x50c   :  { %1745 = vpow2.f32 %v1418_v29 }
 0x510   :  { %v1740_v33 = vpop.eup %1739 }
 0x511   :  { %v1742_v0 = vpop.eup %1741  ;;  %v1006_v44 = vadd.f32 1.0, %v1740_v33 }
 0x512   :  { %v1005_v8 = vadd.f32 1.0, %v1742_v0 }
 0x514   :  { %1747 = vrcp.f32 %v1005_v8 }
 0x515   :  { %v1744_v34 = vpop.eup %1743  ;;  %1749 = vrcp.f32 %v1006_v44 }
 0x516   :  { %v1007_v9 = vadd.f32 1.0, %v1744_v34  ;;  %v1746_v11 = vpop.eup %1745 }
 0x517   :  { %v1008_v12 = vadd.f32 1.0, %v1746_v11 }
 0x518   :  { %1751 = vrcp.f32 %v1007_v9 }
 0x519   :  { %1753 = vrcp.f32 %v1008_v12 }
 0x51e   :  { %v1748_v19 = vpop.eup %1747 }
 0x51f   :  { %1428 = vmatmul.mubr.msk.f32.vlgmr.msra.gmra.mrb[16].mxu0 %vm509_vm4, %v1748_v19  ;;  %v1750_v20 = vpop.eup %1749 }
 0x520   :  { %1212 = vmatprep.mubr.f32.mxu0 %v1797_v57 }
 0x522   :  { %v1752_v21 = vpop.eup %1751 }
 0x523   :  { %1429 = vmatmul.mubr.msk.f32.gmra.mrb[18].mxu0 %vm509_vm4, %v1750_v20  ;;  %v1754_v56 = vpop.eup %1753 }
 0x524   :  { %1218 = vmatprep.mubr.f32.mxu0 %v1797_v57 }
 0x527   :  { %1430 = vmatmul.mubr.msk.f32.gmra.mrb[20].mxu0 %vm509_vm4, %v1752_v21 }
 0x528   :  { %1224 = vmatprep.mubr.f32.mxu0 %v1797_v57 }
 0x52b   :  { %1431 = vmatmul.mubr.msk.f32.gmra.mrb[22].mxu0 %vm509_vm4, %v1754_v56 }
 0x576   :  { %v1604_v10 = vpop.f32.mrb[32].mxu1 }
 0x577   :  { %v1425_v31 = vmul.f32 -1.442695, %v1604_v10  ;;  %v1087_v35 = vpop.f32.mrb[33].mxu1 }
 0x578   :  { %v1424_v36 = vmul.f32 -1.442695, %v1087_v35 }
 0x579   :  { %1755 = vpow2.f32 %v1425_v31 }
 0x57a   :  { %1757 = vpow2.f32 %v1424_v36  ;;  %v1607_v37 = vpop.f32.mrb[34].mxu1 }
 0x57b   :  { %v1097_v38 = vpop.f32.mrb[35].mxu1  ;;  %v1427_v40 = vmul.f32 -1.442695, %v1607_v37 }
 0x57c   :  { %v1426_v39 = vmul.f32 -1.442695, %v1097_v38 }
 0x57e   :  { %1759 = vpow2.f32 %v1426_v39 }
 0x57f   :  { %1761 = vpow2.f32 %v1427_v40 }
 0x583   :  { %v1756_v41 = vpop.eup %1755 }
 0x584   :  { %v1758_v42 = vpop.eup %1757  ;;  %v1119_v45 = vadd.f32 1.0, %v1756_v41 }
 0x585   :  { %v1118_v43 = vadd.f32 1.0, %v1758_v42 }
 0x587   :  { %1763 = vrcp.f32 %v1118_v43 }
 0x588   :  { %v1760_v62 = vpop.eup %1759  ;;  %1765 = vrcp.f32 %v1119_v45 }
 0x589   :  { %v1120_v13 = vadd.f32 1.0, %v1760_v62  ;;  %v1762_v46 = vpop.eup %1761 }
 0x58a   :  { %v1121_v14 = vadd.f32 1.0, %v1762_v46 }
 0x58b   :  { %1767 = vrcp.f32 %v1120_v13 }
 0x58c   :  { %1769 = vrcp.f32 %v1121_v14 }
 0x591   :  { %v1764_v47 = vpop.eup %1763 }
 0x592   :  { %1432 = vmatmul.mubr.msk.f32.vlgmr.msra.gmra.mrb[36].mxu1 %vm509_vm4, %v1764_v47  ;;  %v1766_v48 = vpop.eup %1765 }
 0x593   :  { %1313 = vmatprep.mubr.f32.mxu1 %v1797_v57 }
 0x595   :  { %v1768_v58 = vpop.eup %1767 }
 0x596   :  { %1433 = vmatmul.mubr.msk.f32.gmra.mrb[38].mxu1 %vm509_vm4, %v1766_v48  ;;  %v1770_v59 = vpop.eup %1769 }
 0x597   :  { %1319 = vmatprep.mubr.f32.mxu1 %v1797_v57 }
 0x59a   :  { %1434 = vmatmul.mubr.msk.f32.gmra.mrb[40].mxu1 %vm509_vm4, %v1768_v58 }
 0x59b   :  { %1325 = vmatprep.mubr.f32.mxu1 %v1797_v57 }
 0x59e   :  { %1435 = vmatmul.mubr.msk.f32.gmra.mrb[42].mxu1 %vm509_vm4, %v1770_v59 }
 0x5f2   :  { %v1208_v60 = vpop.f32.mrb[16].mxu0 }
 0x5f3   :  { %v1210_v61 = vpop.f32.mrb[17].mxu0 }
 0x5f6   :  { %v1214_v63 = vpop.f32.mrb[18].mxu0 }
 0x5f7   :  { %v1216_v49 = vpop.f32.mrb[19].mxu0 }
 0x5fa   :  { %v1220_v25 = vpop.f32.mrb[20].mxu0 }
 0x5fb   :  { %v1222_v1 = vpop.f32.mrb[21].mxu0 }
 0x5fe   :  { %v1226_v2 = vpop.f32.mrb[22].mxu0 }
 0x5ff   :  { %v1228_v3 = vpop.f32.mrb[23].mxu0 }
 0x665   :  { %v1309_v4 = vpop.f32.mrb[36].mxu1 }
 0x666   :  { %v1332_v51 = vmul.f32 %v1309_v4, %v1208_v60  ;;  %v1311_v50 = vpop.f32.mrb[37].mxu1 }
 0x667   :  { %v1333_v5 = vmul.f32 %v1311_v50, %v1210_v61 }
 0x668   :  { %v1340_v6 = vmul.f32 %v2046_v16, %v1332_v51 }
 0x669   :  { %v1341_v7 = vmul.f32 %v2041_v15, %v1333_v5  ;;  %v1315_v57 = vpop.f32.mrb[38].mxu1 }
 0x66a   :  { %1349 = vst [vmem:[#allocation2 + $0x40] sm:$0xff] %v1340_v6  ;;  %v1334_v52 = vmul.f32 %v1315_v57, %v1214_v63  ;;  %v1317_v53 = vpop.f32.mrb[39].mxu1 }
 0x66b   :  { %1350 = vst [vmem:[#allocation2 + $0x48] sm:$0xff] %v1341_v7  ;;  %v1335_v54 = vmul.f32 %v1317_v53, %v1216_v49 }
 0x66c   :  { %v1342_v55 = vmul.f32 %v2059_v18, %v1334_v52 }
 0x66d   :  { %v1343_v23 = vmul.f32 %v2051_v17, %v1335_v54  ;;  %v1321_v24 = vpop.f32.mrb[40].mxu1 }
 0x66e   :  { %1351 = vst [vmem:[#allocation2 + $0x50] sm:$0xff] %v1342_v55  ;;  %v1336_v28 = vmul.f32 %v1321_v24, %v1220_v25  ;;  %v1323_v29 = vpop.f32.mrb[41].mxu1 }
 0x66f   :  { %1352 = vst [vmem:[#allocation2 + $0x58] sm:$0xff] %v1343_v23  ;;  %v1337_v32 = vmul.f32 %v1323_v29, %v1222_v1 }
 0x670   :  { %v1344_v16 = vmul.f32 %v2082_v26, %v1336_v28 }
 0x671   :  { %v1345_v15 = vmul.f32 %v2064_v22, %v1337_v32  ;;  %v1327_v33 = vpop.f32.mrb[42].mxu1 }
 0x672   :  { %1353 = vst [vmem:[#allocation2 + $0x60] sm:$0xff] %v1344_v16  ;;  %v1338_v0 = vmul.f32 %v1327_v33, %v1226_v2  ;;  %v1329_v44 = vpop.f32.mrb[43].mxu1 }
 0x673   :  { %1354 = vst [vmem:[#allocation2 + $0x68] sm:$0xff] %v1345_v15  ;;  %v1339_v18 = vmul.f32 %v1329_v44, %v1228_v3 }
 0x674   :  { %v1346_v17 = vmul.f32 %v2110_v30, %v1338_v0 }
 0x675   :  { %v1347_v8 = vmul.f32 %v2089_v27, %v1339_v18 }
 0x676   :  { %1355 = vst [vmem:[#allocation2 + $0x70] sm:$0xff] %v1346_v17 }
 0x677   :  { %1356 = vst [vmem:[#allocation2 + $0x78] sm:$0xff] %v1347_v8 }
 0x678   :  { %1782 = shalt.err (!%p1779_p4)
}
 0x679   :  { %s1783_s20 = scalar_lea.hbm %s2277_s8, 2048 }
 0x67a   :  { %p1784_p5 = scmp.ne.s32.totalorder %s2277_s8, %s1783_s20  ;;  %p1787_p6 = scmp.lt.u32.totalorder %s1783_s20, %s2277_s8 }
 0x67c   :  { %p1789_p7 = pnand %p1787_p6, %p1784_p5 }
 0x67e   :  { %1792 = shalt.err (!%p1789_p7)
}
 0x67f   :  { %s1800_s0 = smov 256   ;;  %s1801_s24 = smov 16  }
 0x680   :  { %1368 = dma.vmem_to_hbm [thread:$0]  %s1363_s11, 2048, %s2277_s8, [#allocation3], %s1800_s0, %s1800_s0, %s1801_s24  }
 0x681   :  { %1793 = dma.done.wait [#allocation3], 2048  }
 0x682   :  { %1794 = vsyncadd [#allocation3], 4294965248 }
 0x683   :  { %1372 = vsyncpa [#allocation3], 1 }

</bundles_post_ra>
